<compile_context>
chip_gen: v6e
topology: v6e:2x2x1
jax: 0.10.0
libtpu: 0.0.40
codegen_flags: <defaults>
</compile_context>

<pallas_src>
import functools

import jax
import jax.numpy as jnp
from jax import lax
from jax.experimental import pallas as pl
from jax.experimental.pallas import tpu as pltpu

LANES = 128
CHUNK_ROWS = 1024          # rows per inner reduction chunk (<= 512 KiB f32 temp)


def _round_up(x, m):
    return ((x + m - 1) // m) * m


def _device_kind():
    try:
        return (jax.devices()[0].device_kind or "").lower()
    except Exception:
        return ""


def _core_config(kind):
    """Returns (num_tensorcores_to_target, use_core_parallel_semantics)."""
    if "v7" in kind or "7x" in kind:
        return 2, True          # v7x: 2 TCs per chip; CORE_PARALLEL shards them
    if "v4" in kind or "v5p" in kind:
        return 2, False         # megacore: plain "parallel" shards the axis
    return 1, False             # v5e / v6e / unknown: single TensorCore


def _tile_byte_budget(kind):
    """Per-input, per-buffer tile bytes (2 inputs x 2 pipeline buffers)."""
    if "v6" in kind or "v7" in kind or "7x" in kind:
        return 4 * 1024 * 1024  # 16 MiB total buffers, inside 32 MiB default
    return 2 * 1024 * 1024      # 8 MiB total, well under v5e's 16 MiB default


def _l1_partial_sums(p2, t2, *, rows, tile_rows, num_blocks, ncores, bpc,
                     core_parallel):
    """Pallas call returning (ncores, 8, LANES) f32 partial sums of |p - t|."""
    last_partial = (rows % tile_rows) != 0
    has_overshoot = (ncores * bpc) != num_blocks
    chunk = min(CHUNK_ROWS, tile_rows)
    n_chunks = tile_rows // chunk
    assert n_chunks * chunk == tile_rows and chunk % 8 == 0

    def in_map(c, j):
        b = c * bpc + j
        if has_overshoot:
            # Clamp overshoot blocks (odd split across cores) to a valid block;
            # their compute is skipped in-kernel via pl.when.
            b = jnp.minimum(b, num_blocks - 1)
        return (b, 0)

    def kernel(p_ref, t_ref, o_ref):
        c = pl.program_id(0)
        j = pl.program_id(1)
        b = c * bpc + j

        @pl.when(j == 0)
        def _():
            o_ref[...] = jnp.zeros_like(o_ref)

        def chunk_sum(r0, mask_rows):
            p = p_ref[pl.ds(r0, chunk), :].astype(jnp.float32)
            t = t_ref[pl.ds(r0, chunk), :].astype(jnp.float32)
            a = jnp.abs(p - t)
            if mask_rows:
                gr = (b * tile_rows + r0
                      + lax.broadcasted_iota(jnp.int32, (chunk, LANES), 0))
                a = jnp.where(gr < rows, a, 0.0)
            # (chunk, 128) -> (chunk//8, 8, 128) -> (8, 128): pure vreg adds.
            return a.reshape(chunk // 8, 8, LANES).sum(axis=0)

        def reduce_tile(mask_rows):
            if n_chunks == 1:
                o_ref[...] += chunk_sum(0, mask_rows)
            else:
                def body(i, acc):
                    r0 = pl.multiple_of(i * chunk, chunk)
                    return acc + chunk_sum(r0, mask_rows)
                o_ref[...] += lax.fori_loop(
                    0, n_chunks, body, jnp.zeros((8, LANES), jnp.float32))

        if last_partial:
            # Fast path for all full blocks; mask only the last (partial) one.
            @pl.when(b < num_blocks - 1)
            def _():
                reduce_tile(False)

            @pl.when(b == num_blocks - 1)
            def _():
                reduce_tile(True)
        elif has_overshoot:
            @pl.when(b < num_blocks)
            def _():
                reduce_tile(False)
        else:
            reduce_tile(False)

    if core_parallel:
        semantics = (pltpu.CORE_PARALLEL, pltpu.ARBITRARY)
    else:
        semantics = ("parallel", "arbitrary")

    bytes_accessed = rows * LANES * (p2.dtype.itemsize + t2.dtype.itemsize)
    cost = pl.CostEstimate(flops=3 * rows * LANES, transcendentals=0,
                           bytes_accessed=bytes_accessed + ncores * 8 * LANES * 4)

    return pl.pallas_call(
        kernel,
        out_shape=jax.ShapeDtypeStruct((ncores, 8, LANES), jnp.float32),
        grid_spec=pltpu.PrefetchScalarGridSpec(
            num_scalar_prefetch=0,
            grid=(ncores, bpc),
            in_specs=[
                pl.BlockSpec((tile_rows, LANES), in_map),
                pl.BlockSpec((tile_rows, LANES), in_map),
            ],
            out_specs=pl.BlockSpec((None, 8, LANES), lambda c, j: (c, 0, 0)),
        ),
        compiler_params=pltpu.CompilerParams(dimension_semantics=semantics),
        cost_estimate=cost,
    )(p2, t2)


def l1_loss(pred, target):
    """Mean absolute error, matching torch.nn.L1Loss() (reduction='mean')."""
    assert pred.shape == target.shape, "L1Loss expects matching shapes"
    n = pred.size
    if n == 0:
        # torch.nn.L1Loss returns nan for empty inputs (0 / 0).
        return jnp.asarray(jnp.nan, dtype=pred.dtype)

    p = pred.reshape(-1)
    t = target.reshape(-1)

    rows = n // LANES           # full 128-wide rows handled by the kernel
    tail = n - rows * LANES     # < 128 leftover elements (plain jnp below)

    total = jnp.float32(0.0)

    if rows > 0:
        p2 = (p if tail == 0 else p[: rows * LANES]).reshape(rows, LANES)
        t2 = (t if tail == 0 else t[: rows * LANES]).reshape(rows, LANES)

        kind = _device_kind()
        ncores, want_core_parallel = _core_config(kind)

        itemsize = max(p2.dtype.itemsize, t2.dtype.itemsize)
        sub = max(8, 32 // max(1, itemsize))            # native sublane tile
        budget_rows = _tile_byte_budget(kind) // (LANES * itemsize)
        tile_rows = min(budget_rows, _round_up(rows, sub))
        if tile_rows > CHUNK_ROWS:
            tile_rows = _round_up(tile_rows, CHUNK_ROWS)

        num_blocks = pl.cdiv(rows, tile_rows)
        if num_blocks < ncores:                         # not enough work to split
            ncores, want_core_parallel = 1, False
        bpc = pl.cdiv(num_blocks, ncores)               # blocks per core

        call = functools.partial(
            _l1_partial_sums, p2, t2, rows=rows, tile_rows=tile_rows,
            num_blocks=num_blocks, ncores=ncores, bpc=bpc)
        if want_core_parallel:
            try:
                partials = call(core_parallel=True)
            except Exception:
                # Safe fallback if CORE_PARALLEL semantics are unsupported here.
                partials = call(core_parallel=False)
        else:
            partials = call(core_parallel=False)
        total = total + jnp.sum(partials)

    if tail > 0:
        pt = p[rows * LANES:].astype(jnp.float32)
        tt = t[rows * LANES:].astype(jnp.float32)
        total = total + jnp.sum(jnp.abs(pt - tt))

    # reduction='mean'; return in the input dtype like torch.nn.L1Loss.
    return (total / jnp.float32(n)).astype(pred.dtype)


if __name__ == "__main__":
    key = jax.random.PRNGKey(0)
    k1, k2, k3, k4 = jax.random.split(key, 4)

    # Main test: small NCHW-style prediction/target pair (f32).
    pred = jax.random.normal(k1, (2, 4, 16, 16), dtype=jnp.float32)
    target = jax.random.normal(k2, (2, 4, 16, 16), dtype=jnp.float32)
    loss = l1_loss(pred, target)
    jax.block_until_ready(loss)
    ref = jnp.mean(jnp.abs(pred - target))
    assert jnp.allclose(loss, ref, rtol=1e-5, atol=1e-6), (loss, ref)

    # Secondary test: bf16 inputs with a non-multiple-of-128 element count
    # (exercises in-kernel dtype cast, last-block masking and the jnp tail).
    pb = jax.random.normal(k3, (2, 4, 10, 13), dtype=jnp.bfloat16)
    tb = jax.random.normal(k4, (2, 4, 10, 13), dtype=jnp.bfloat16)
    loss_b = l1_loss(pb, tb)
    jax.block_until_ready(loss_b)
    ref_b = jnp.mean(jnp.abs(pb.astype(jnp.float32) - tb.astype(jnp.float32)))
    assert jnp.allclose(loss_b.astype(jnp.float32), ref_b,
                        rtol=2e-2, atol=1e-3), (loss_b, ref_b)

    # Medium test: ragged row count (exercises the chunked fori_loop reduce,
    # the masked last block and the tail path together).
    pc = jax.random.normal(k1, (2, 16, 65, 131), dtype=jnp.float32)
    tc = jax.random.normal(k2, (2, 16, 65, 131), dtype=jnp.float32)
    loss_c = l1_loss(pc, tc)
    jax.block_until_ready(loss_c)
    ref_c = jnp.mean(jnp.abs(pc - tc))
    assert jnp.allclose(loss_c, ref_c, rtol=1e-4, atol=1e-6), (loss_c, ref_c)

    print("KERNEL_OK")
</pallas_src>

<mosaic_0001>
module attributes {stable_mosaic.version = 11 : i64} {
  func.func @kernel(%arg0: i32, %arg1: i32, %arg2: memref<16x128xf32, #tpu.memory_space<vmem>>, %arg3: memref<16x128xf32, #tpu.memory_space<vmem>>, %arg4: memref<1x8x128xf32, #tpu.memory_space<vmem>>) attributes {dimension_semantics = [#tpu.dimension_semantics<parallel>, #tpu.dimension_semantics<arbitrary>], iteration_bounds = array<i64: 1, 1>, scalar_prefetch = 0 : i64, scratch_operands = 0 : i64, tpu.core_type = #tpu.core_type<tc>, window_params = [{transform_indices = @transform_0, window_bounds = array<i64: 16, 128>}, {transform_indices = @transform_1, window_bounds = array<i64: 16, 128>}, {transform_indices = @transform_2, window_bounds = array<i64: 1, 8, 128>}]} {
    %c0_i32 = arith.constant 0 : i32
    %0 = arith.cmpi eq, %arg1, %c0_i32 : i32
    %1 = arith.extui %0 : i1 to i32
    %c0_i32_0 = arith.constant 0 : i32
    %2 = arith.cmpi ne, %1, %c0_i32_0 : i32
    scf.if %2 {
      %cst_10 = arith.constant 0.000000e+00 : f32
      %15 = vector.broadcast %cst_10 : f32 to vector<8x128xf32>
      %c0_11 = arith.constant 0 : index
      %c0_12 = arith.constant 0 : index
      %c0_13 = arith.constant 0 : index
      %16 = vector.load %arg4[%c0_11, %c0_12, %c0_13] : memref<1x8x128xf32, #tpu.memory_space<vmem>>, vector<1x8x128xf32>
      %17 = vector.shape_cast %16 : vector<1x8x128xf32> to vector<8x128xf32>
      %18 = vector.shape_cast %15 : vector<8x128xf32> to vector<1x8x128xf32>
      tpu.vector_store %arg4[%c0_11, %c0_12, %c0_13], %18 {strides = array<i32>} : memref<1x8x128xf32, #tpu.memory_space<vmem>>, vector<1x8x128xf32>,
    } else {
    }
    %c0 = arith.constant 0 : index
    %c0_1 = arith.constant 0 : index
    %c0_2 = arith.constant 0 : index
    %3 = vector.load %arg4[%c0, %c0_1, %c0_2] : memref<1x8x128xf32, #tpu.memory_space<vmem>>, vector<1x8x128xf32>
    %4 = vector.shape_cast %3 : vector<1x8x128xf32> to vector<8x128xf32>
    %c0_3 = arith.constant 0 : index
    %c0_4 = arith.constant 0 : index
    %5 = vector.load %arg2[%c0_3, %c0_4] : memref<16x128xf32, #tpu.memory_space<vmem>>, vector<16x128xf32>
    %c0_5 = arith.constant 0 : index
    %c0_6 = arith.constant 0 : index
    %6 = vector.load %arg3[%c0_5, %c0_6] : memref<16x128xf32, #tpu.memory_space<vmem>>, vector<16x128xf32>
    %7 = arith.subf %5, %6 : vector<16x128xf32>
    %8 = math.absf %7 : vector<16x128xf32>
    %9 = vector.shape_cast %8 : vector<16x128xf32> to vector<2x8x128xf32>
    %cst = arith.constant dense<0.000000e+00> : vector<8x128xf32>
    %10 = vector.multi_reduction <add>, %9, %cst [0] : vector<2x8x128xf32> to vector<8x128xf32>
    %11 = arith.addf %4, %10 : vector<8x128xf32>
    %c0_7 = arith.constant 0 : index
    %c0_8 = arith.constant 0 : index
    %c0_9 = arith.constant 0 : index
    %12 = vector.load %arg4[%c0_7, %c0_8, %c0_9] : memref<1x8x128xf32, #tpu.memory_space<vmem>>, vector<1x8x128xf32>
    %13 = vector.shape_cast %12 : vector<1x8x128xf32> to vector<8x128xf32>
    %14 = vector.shape_cast %11 : vector<8x128xf32> to vector<1x8x128xf32>
    tpu.vector_store %arg4[%c0_7, %c0_8, %c0_9], %14 {strides = array<i32>} : memref<1x8x128xf32, #tpu.memory_space<vmem>>, vector<1x8x128xf32>,
    return
  }
  func.func @transform_0(%arg0: i32, %arg1: i32) -> (i32, i32) {
    %c1_i32 = arith.constant 1 : i32
    %0 = arith.muli %arg0, %c1_i32 : i32
    %1 = arith.addi %0, %arg1 : i32
    %c0_i32 = arith.constant 0 : i32
    %c0_i32_0 = arith.constant 0 : i32
    return %1, %c0_i32 : i32, i32
  }
  func.func @transform_1(%arg0: i32, %arg1: i32) -> (i32, i32) {
    %c1_i32 = arith.constant 1 : i32
    %0 = arith.muli %arg0, %c1_i32 : i32
    %1 = arith.addi %0, %arg1 : i32
    %c0_i32 = arith.constant 0 : i32
    %c0_i32_0 = arith.constant 0 : i32
    return %1, %c0_i32 : i32, i32
  }
  func.func @transform_2(%arg0: i32, %arg1: i32) -> (i32, i32, i32) {
    %c0_i32 = arith.constant 0 : i32
    %c0_i32_0 = arith.constant 0 : i32
    %c0_i32_1 = arith.constant 0 : i32
    return %arg0, %c0_i32, %c0_i32_0 : i32, i32, i32
  }
}

</mosaic_0001>

<bundles_post_ra>
// kernel: tpu_custom_call.1
= control target key start
LH: loop header
LB: loop body
LE: loop exit
PB: predicated region body
PF: predicated region fallthrough
CT: control target
= control target key end

     0   :  { %7 = vsyncpa [#allocation3], 0  ;;  %s186_s0 = inlined_call_operand.hbm [shape: f32[16,128], index: 0, kind: input, shape index: {}]   ;;  %s187_s1 = inlined_call_operand.hbm [shape: f32[16,128], index: 1, kind: input, shape index: {}]   ;;  %s188_s2 = inlined_call_operand.hbm [shape: f32[1,8,128], index: 2, kind: output, shape index: {}]  }
   0x1   :  { %8 = vsyncpa [#allocation6], 0 }
   0x2   :  { %9 = vsyncpa [#allocation4], 0  ;;  %s157_s9 = smov [#allocation2]  }
   0x3   :  { %s19_s10 = sshll.u32 %s157_s9, 4  ;;  %s20_s10 = int_to_ptr.vmem [resolvable:$true] %s19_s10 }
   0x4   :  { %s99_s11 = scalar_lea.vmem %s20_s10, 256  ;;  %p104_p1 = scmp.lt.s32.totalorder %s20_s10, %s20_s10 }
   0x5   :  { %p100_p0 = scmp.ne.s32.totalorder %s20_s10, %s99_s11  ;;  %p105_p2 = scmp.lt.s32.totalorder %s99_s11, %s99_s11 }
   0x7   :  { %p106_p3 = por %p105_p2, %p104_p1 }
   0x9   :  { %p107_p4 = pnand %p106_p3, %p100_p0 }
   0xb   :  { %110 = shalt.err (!%p107_p4)
}
   0xc   :  { %s158_s12 = smov 128   ;;  %s159_s13 = smov 8  }
   0xd   :  { %25 = dma.hbm_to_vmem [thread:$0]  %s186_s0, 256, %s20_s10, [#allocation3], %s158_s12, %s158_s12, %s159_s13  }
   0xe   :  { %s160_s16 = smov [#allocation5]  }
   0xf   :  { %s35_s17 = sshll.u32 %s160_s16, 4  ;;  %s36_s17 = int_to_ptr.vmem [resolvable:$true] %s35_s17 }
  0x10   :  { %s119_s18 = scalar_lea.vmem %s36_s17, 256  ;;  %p124_p6 = scmp.lt.s32.totalorder %s36_s17, %s36_s17 }
  0x11   :  { %p120_p5 = scmp.ne.s32.totalorder %s36_s17, %s119_s18  ;;  %p125_p7 = scmp.lt.s32.totalorder %s119_s18, %s119_s18 }
  0x13   :  { %p126_p8 = por %p125_p7, %p124_p6 }
  0x15   :  { %p127_p9 = pnand %p126_p8, %p120_p5 }
  0x17   :  { %130 = shalt.err (!%p127_p9)
}
  0x18   :  { %41 = dma.hbm_to_vmem [thread:$0]  %s187_s1, 256, %s36_s17, [#allocation6], %s158_s12, %s158_s12, %s159_s13  }
  0x19   :  { %151 = dma.done.wait [#allocation3], 256  }
  0x1a   :  { %152 = vsyncadd [#allocation3], 4294967040 }
  0x1b   :  { %153 = dma.done.wait [#allocation6], 256  }
  0x1c   :  { %154 = vsyncadd [#allocation6], 4294967040  ;;  %v58_v0 = vld [vmem:[#allocation2] sm:$0xff]  ;;  %v59_v1 = vld [vmem:[#allocation2 + $0x8] sm:$0xff]  ;;  %s161_s0 = smov [#allocation7]  }
  0x1d   :  { %v60_v2 = vld [vmem:[#allocation5] sm:$0xff]  ;;  %v61_v3 = vld [vmem:[#allocation5 + $0x8] sm:$0xff]  ;;  %s75_s21 = sshll.u32 %s161_s0, 4  ;;  %s76_s21 = int_to_ptr.vmem [resolvable:$true] %s75_s21 }
  0x1e   :  { %v62_v4 = vsub.f32 %v58_v0, %v60_v2  ;;  %v63_v5 = vsub.f32 %v59_v1, %v61_v3  ;;  %s131_s22 = scalar_lea.vmem %s76_s21, 128  ;;  %p136_p11 = scmp.lt.s32.totalorder %s76_s21, %s76_s21 }
  0x1f   :  { %p132_p10 = scmp.ne.s32.totalorder %s76_s21, %s131_s22  ;;  %p137_p12 = scmp.lt.s32.totalorder %s131_s22, %s131_s22 }
  0x20   :  { %v64_v6 = vand.u32 2147483647, %v62_v4  ;;  %v65_v7 = vand.u32 2147483647, %v63_v5 }
  0x21   :  { %p138_p13 = por %p137_p12, %p136_p11 }
  0x22   :  { %v66_v8 = vadd.f32 %v65_v7, %v64_v6 }
  0x23   :  { %p139_p0 = pnand %p138_p13, %p132_p10 }
  0x24   :  { %68 = vst [vmem:[#allocation7] sm:$0xff] %v66_v8 }
  0x25   :  { %142 = shalt.err (!%p139_p0)
}
  0x26   :  { %78 = dma.vmem_to_hbm [thread:$0]  %s76_s21, 128, %s188_s2, [#allocation4]  }
  0x27   :  { %155 = dma.done.wait [#allocation4], 128  }
  0x28   :  { %156 = vsyncadd [#allocation4], 4294967168 }
  0x29   :  { %82 = vsyncpa [#allocation3], 1 }
  0x2a   :  { %83 = vsyncpa [#allocation6], 1 }
  0x2b   :  { %84 = vsyncpa [#allocation4], 1 }

</bundles_post_ra>
